<compile_context>
chip_gen: v5e
topology: v5e:2x2
jax: 0.10.0
libtpu: 0.0.40
codegen_flags: <defaults>
</compile_context>

<pallas_src>
import functools

import jax
import jax.numpy as jnp
from jax.experimental import pallas as pl
from jax.experimental.pallas import tpu as pltpu


def _round_up(x, m):
    return (x + m - 1) // m * m


def _pick_vmem_limit():
    """~3/4 of physical VMEM, clamped to [32, 96] MiB (v5e/v6e -> 96 MiB, v7x -> 48 MiB)."""
    try:
        cap = pltpu.get_tpu_info().vmem_capacity_bytes
    except Exception:
        cap = 64 * 1024 * 1024
    return int(min(96 * 1024 * 1024, max(32 * 1024 * 1024, (cap * 3) // 4)))


def _pick_m_tiling(batch):
    """Return (Mp, tm): padded batch and M-tile. >=2 grid steps for large batches."""
    Mp = _round_up(batch, 16)                      # bf16 sublane packing
    if Mp <= 256:
        return Mp, Mp                              # small batch: one grid step
    # Large batch: tiles in ~[256, 1024], at least 2 grid steps (v7x megacore),
    # tile chosen so M padding stays minimal.
    n_tiles = max(2, pl.cdiv(Mp, 1024))
    tm = _round_up(pl.cdiv(Mp, n_tiles), 16)
    Mp = _round_up(Mp, tm)
    return Mp, tm


# ---------------------------------------------------------------------------
# Fused kernel: q, h' = forward(state_tile, h_tile)   (all weights resident)
# ---------------------------------------------------------------------------
def _rnn_fused_kernel(x_ref, h_ref,
                      w1_ref, b1_ref,
                      wg_ref, bg_ref,
                      w2_ref, b2_ref,
                      q_ref, hout_ref, *, hp):
    # fc1 + ReLU (bf16 MXU inputs, f32 accumulation)
    x1 = jnp.dot(x_ref[...], w1_ref[...], preferred_element_type=jnp.float32)
    x1 = jnp.maximum(x1 + b1_ref[...], 0.0)

    h = h_ref[...]                                 # f32 previous hidden state

    # Single fused GRU GEMM: [x1 | h]  (K = 2*hp)  @  W_gru (2*hp, 4*hp)
    # output lane blocks: r_sum | z_sum | gi_n | gh_n   (biases pre-arranged).
    xh = jnp.concatenate([x1.astype(jnp.bfloat16), h.astype(jnp.bfloat16)], axis=1)
    g = jnp.dot(xh, wg_ref[...], preferred_element_type=jnp.float32) + bg_ref[...]

    r = jax.nn.sigmoid(g[:, 0:hp])
    z = jax.nn.sigmoid(g[:, hp:2 * hp])
    n = jnp.tanh(g[:, 2 * hp:3 * hp] + r * g[:, 3 * hp:4 * hp])
    h_new = (1.0 - z) * n + z * h                  # PyTorch GRUCell update

    # fc2 head
    q = jnp.dot(h_new.astype(jnp.bfloat16), w2_ref[...],
                preferred_element_type=jnp.float32) + b2_ref[...]

    q_ref[...] = q
    hout_ref[...] = h_new


# ---------------------------------------------------------------------------
# Parameter handling
# ---------------------------------------------------------------------------
def init_params(key, input_dim, hidden, n_actions):
    """PyTorch-layout f32 parameters (nn.Linear / nn.GRUCell conventions)."""
    ks = jax.random.split(key, 8)
    s = 0.1
    return {
        "fc1_w": jax.random.normal(ks[0], (hidden, input_dim), jnp.float32) * s,
        "fc1_b": jax.random.normal(ks[1], (hidden,), jnp.float32) * s,
        # GRUCell: rows ordered (r, z, n)
        "w_ih": jax.random.normal(ks[2], (3 * hidden, hidden), jnp.float32) * s,
        "w_hh": jax.random.normal(ks[3], (3 * hidden, hidden), jnp.float32) * s,
        "b_ih": jax.random.normal(ks[4], (3 * hidden,), jnp.float32) * s,
        "b_hh": jax.random.normal(ks[5], (3 * hidden,), jnp.float32) * s,
        "fc2_w": jax.random.normal(ks[6], (n_actions, hidden), jnp.float32) * s,
        "fc2_b": jax.random.normal(ks[7], (n_actions,), jnp.float32) * s,
    }


def prepare_params(params, input_dim, hidden, n_actions):
    """One-time prep: transpose to (in, out), pad to 128-lane multiples, cast weights
    to bf16, and build the fused GRU weight:
        W_gru (2*Hp, 4*Hp) = [[W_ih_r^T, W_ih_z^T, W_ih_n^T, 0      ],
                              [W_hh_r^T, W_hh_z^T, 0,        W_hh_n^T]]
        b_gru (1, 4*Hp)    = [b_ih_r+b_hh_r | b_ih_z+b_hh_z | b_ih_n | b_hh_n]
    """
    Kp = _round_up(input_dim, 128)
    Hp = _round_up(hidden, 128)
    Ap = _round_up(n_actions, 128)
    H = hidden

    def pad2(a, rows, cols):
        return jnp.pad(a, ((0, rows - a.shape[0]), (0, cols - a.shape[1])))

    def w_t_pad(w, rows, cols):            # torch (out,in) -> padded (in,out) f32
        return pad2(w.T.astype(jnp.float32), rows, cols)

    def b_pad(b, cols):
        return jnp.pad(b.astype(jnp.float32), (0, cols - b.shape[0]))

    wih = [w_t_pad(params["w_ih"][g * H:(g + 1) * H, :], Hp, Hp) for g in range(3)]
    whh = [w_t_pad(params["w_hh"][g * H:(g + 1) * H, :], Hp, Hp) for g in range(3)]
    bih = [b_pad(params["b_ih"][g * H:(g + 1) * H], Hp) for g in range(3)]
    bhh = [b_pad(params["b_hh"][g * H:(g + 1) * H], Hp) for g in range(3)]
    zblk = jnp.zeros((Hp, Hp), jnp.float32)

    w_top = jnp.concatenate([wih[0], wih[1], wih[2], zblk], axis=1)   # x1 path
    w_bot = jnp.concatenate([whh[0], whh[1], zblk, whh[2]], axis=1)   # h  path
    w_gru = jnp.concatenate([w_top, w_bot], axis=0).astype(jnp.bfloat16)
    b_gru = jnp.concatenate(
        [bih[0] + bhh[0], bih[1] + bhh[1], bih[2], bhh[2]]).reshape(1, 4 * Hp)

    return {
        "Kp": Kp, "Hp": Hp, "Ap": Ap,
        "w1": pad2(params["fc1_w"].T.astype(jnp.float32), Kp, Hp).astype(jnp.bfloat16),
        "b1": b_pad(params["fc1_b"], Hp).reshape(1, Hp),
        "w_gru": w_gru,
        "b_gru": b_gru,
        "w2": pad2(params["fc2_w"].T.astype(jnp.float32), Hp, Ap).astype(jnp.bfloat16),
        "b2": b_pad(params["fc2_b"], Ap).reshape(1, Ap),
    }


# ---------------------------------------------------------------------------
# Forward wrapper (matches RNNNetwork.forward: returns (q, h))
# ---------------------------------------------------------------------------
def rnn_forward(prep, state, hidden_state, *, hidden, n_actions):
    """One fused forward step.

    `hidden_state` may be the PyTorch-style hidden (reshapeable to (B, hidden)) OR the
    padded (Mp, Hp) f32 slab returned by a previous call; the latter is the zero-copy
    recurrent path (no pad/slice per timestep, updated in place via aliasing).

    Returns (q[B, n_actions], h_pad[Mp, Hp]);  h_pad[:B, :hidden] is the PyTorch `h`.
    """
    B, in_dim = state.shape
    Kp, Hp, Ap = prep["Kp"], prep["Hp"], prep["Ap"]

    Mp, tm = _pick_m_tiling(B)

    # state: cast to bf16 first, then pad (half the bytes for the wrapper pad op)
    x_pad = jnp.pad(state.astype(jnp.bfloat16), ((0, Mp - B), (0, Kp - in_dim)))

    if hidden_state.shape == (Mp, Hp):
        h_pad = hidden_state.astype(jnp.float32)          # padded recurrent slab
    else:
        h_in = hidden_state.reshape(-1, hidden).astype(jnp.float32)
        h_pad = jnp.pad(h_in, ((0, Mp - h_in.shape[0]), (0, Hp - hidden)))

    kernel = functools.partial(_rnn_fused_kernel, hp=Hp)

    flops = 2 * Mp * (Kp * Hp + (2 * Hp) * (4 * Hp) + Hp * Ap)
    transcendentals = 6 * Mp * Hp                          # 2 sigmoid + 1 tanh, ~2 EUP ops each
    bytes_accessed = (x_pad.size * 2 + 2 * Mp * Hp * 4 + Mp * Ap * 4
                      + prep["w1"].size * 2 + prep["w_gru"].size * 2 + prep["w2"].size * 2
                      + (prep["b1"].size + prep["b_gru"].size + prep["b2"].size) * 4)

    resident = pl.Buffered(1)   # constant-index weights: single-buffered residents

    q_pad, h_new_pad = pl.pallas_call(
        kernel,
        out_shape=(jax.ShapeDtypeStruct((Mp, Ap), jnp.float32),
                   jax.ShapeDtypeStruct((Mp, Hp), jnp.float32)),
        grid=(Mp // tm,),
        in_specs=[
            pl.BlockSpec((tm, Kp), lambda i: (i, 0)),                              # state tile (bf16)
            pl.BlockSpec((tm, Hp), lambda i: (i, 0)),                              # hidden tile (f32)
            pl.BlockSpec((Kp, Hp), lambda i: (0, 0), pipeline_mode=resident),      # fc1 weight
            pl.BlockSpec((1, Hp), lambda i: (0, 0)),                               # fc1 bias
            pl.BlockSpec((2 * Hp, 4 * Hp), lambda i: (0, 0), pipeline_mode=resident),  # fused GRU weight
            pl.BlockSpec((1, 4 * Hp), lambda i: (0, 0)),                           # fused GRU bias
            pl.BlockSpec((Hp, Ap), lambda i: (0, 0), pipeline_mode=resident),      # fc2 weight
            pl.BlockSpec((1, Ap), lambda i: (0, 0)),                               # fc2 bias
        ],
        out_specs=(
            pl.BlockSpec((tm, Ap), lambda i: (i, 0)),                              # q
            pl.BlockSpec((tm, Hp), lambda i: (i, 0)),                              # h'
        ),
        input_output_aliases={1: 1},                       # h_pad updated in place
        compiler_params=pltpu.CompilerParams(
            dimension_semantics=("parallel",),
            vmem_limit_bytes=_pick_vmem_limit()),
        cost_estimate=pl.CostEstimate(
            flops=flops, transcendentals=transcendentals,
            bytes_accessed=bytes_accessed),
    )(x_pad, h_pad,
      prep["w1"], prep["b1"], prep["w_gru"], prep["b_gru"],
      prep["w2"], prep["b2"])

    return q_pad[:B, :n_actions], h_new_pad


# ---------------------------------------------------------------------------
# Pure-JAX f32 reference (PyTorch GRUCell semantics) for verification
# ---------------------------------------------------------------------------
def _ref_forward(params, state, hidden_state, *, hidden):
    H = hidden
    x = jax.nn.relu(state @ params["fc1_w"].T + params["fc1_b"])
    h = hidden_state.reshape(-1, H)
    gi = x @ params["w_ih"].T + params["b_ih"]
    gh = h @ params["w_hh"].T + params["b_hh"]
    r = jax.nn.sigmoid(gi[:, 0:H] + gh[:, 0:H])
    z = jax.nn.sigmoid(gi[:, H:2 * H] + gh[:, H:2 * H])
    n = jnp.tanh(gi[:, 2 * H:3 * H] + r * gh[:, 2 * H:3 * H])
    h_new = (1.0 - z) * n + z * h
    q = h_new @ params["fc2_w"].T + params["fc2_b"]
    return q, h_new


# TODO(synk): optimizer (RMSprop), MSE loss, and checkpoint save/load are host-side
# training utilities with no kernel equivalent; only forward() is implemented.

if __name__ == "__main__":
    batch, input_dim, hidden, n_actions = 2, 8, 32, 6

    key = jax.random.PRNGKey(0)
    pkey, s0key, s1key, hkey = jax.random.split(key, 4)
    params = init_params(pkey, input_dim, hidden, n_actions)
    prep = prepare_params(params, input_dim, hidden, n_actions)

    state0 = jax.random.normal(s0key, (batch, input_dim), jnp.float32)
    state1 = jax.random.normal(s1key, (batch, input_dim), jnp.float32)
    hidden_state = jax.random.normal(hkey, (batch, hidden), jnp.float32)

    # Step 1: PyTorch-layout hidden in, padded recurrent slab out.
    q0, h_pad = rnn_forward(prep, state0, hidden_state, hidden=hidden, n_actions=n_actions)
    h0 = h_pad[:batch, :hidden]
    # Step 2: feed the padded slab straight back (no pad/slice on the recurrent path).
    q1, h_pad = rnn_forward(prep, state1, h_pad, hidden=hidden, n_actions=n_actions)
    h1 = h_pad[:batch, :hidden]

    q0, h0, q1, h1 = jax.block_until_ready((q0, h0, q1, h1))

    assert q0.shape == (batch, n_actions) and h0.shape == (batch, hidden)
    assert q1.shape == (batch, n_actions) and h1.shape == (batch, hidden)

    q0_ref, h0_ref = _ref_forward(params, state0, hidden_state, hidden=hidden)
    q1_ref, h1_ref = _ref_forward(params, state1, h0_ref, hidden=hidden)

    # bf16 matmul inputs with f32 accumulation -> loose-but-tight-enough tolerance
    assert jnp.allclose(q0, q0_ref, rtol=2e-2, atol=2e-2)
    assert jnp.allclose(h0, h0_ref, rtol=2e-2, atol=2e-2)
    assert jnp.allclose(q1, q1_ref, rtol=2e-2, atol=2e-2)
    assert jnp.allclose(h1, h1_ref, rtol=2e-2, atol=2e-2)

    print("KERNEL_OK")
</pallas_src>

<mosaic_0001>
module attributes {stable_mosaic.version = 11 : i64} {
  func.func @_rnn_fused_kernel(%arg0: i32, %arg1: memref<16x128xbf16, #tpu.memory_space<vmem>>, %arg2: memref<16x128xf32, #tpu.memory_space<vmem>>, %arg3: memref<128x128xbf16, #tpu.memory_space<vmem>>, %arg4: memref<1x128xf32, #tpu.memory_space<vmem>>, %arg5: memref<256x512xbf16, #tpu.memory_space<vmem>>, %arg6: memref<1x512xf32, #tpu.memory_space<vmem>>, %arg7: memref<128x128xbf16, #tpu.memory_space<vmem>>, %arg8: memref<1x128xf32, #tpu.memory_space<vmem>>, %arg9: memref<16x128xf32, #tpu.memory_space<vmem>>, %arg10: memref<16x128xf32, #tpu.memory_space<vmem>>) attributes {dimension_semantics = [#tpu.dimension_semantics<parallel>], iteration_bounds = array<i64: 1>, scalar_prefetch = 0 : i64, scratch_operands = 0 : i64, tpu.core_type = #tpu.core_type<tc>, window_params = [{transform_indices = @transform_0, window_bounds = array<i64: 16, 128>}, {transform_indices = @transform_1, window_bounds = array<i64: 16, 128>}, {pipeline_mode = #tpu.pipeline_mode<synchronous>, transform_indices = @transform_2, window_bounds = array<i64: 128, 128>}, {pipeline_mode = #tpu.pipeline_mode<synchronous>, transform_indices = @transform_3, window_bounds = array<i64: 1, 128>}, {pipeline_mode = #tpu.pipeline_mode<synchronous>, transform_indices = @transform_4, window_bounds = array<i64: 256, 512>}, {pipeline_mode = #tpu.pipeline_mode<synchronous>, transform_indices = @transform_5, window_bounds = array<i64: 1, 512>}, {pipeline_mode = #tpu.pipeline_mode<synchronous>, transform_indices = @transform_6, window_bounds = array<i64: 128, 128>}, {pipeline_mode = #tpu.pipeline_mode<synchronous>, transform_indices = @transform_7, window_bounds = array<i64: 1, 128>}, {transform_indices = @transform_8, window_bounds = array<i64: 16, 128>}, {transform_indices = @transform_9, window_bounds = array<i64: 16, 128>}]} {
    %c0 = arith.constant 0 : index
    %c0_0 = arith.constant 0 : index
    %0 = vector.load %arg1[%c0, %c0_0] : memref<16x128xbf16, #tpu.memory_space<vmem>>, vector<16x128xbf16>
    %c0_1 = arith.constant 0 : index
    %c0_2 = arith.constant 0 : index
    %1 = vector.load %arg3[%c0_1, %c0_2] : memref<128x128xbf16, #tpu.memory_space<vmem>>, vector<128x128xbf16>
    %cst = arith.constant dense<0.000000e+00> : vector<16x128xf32>
    %2 = tpu.matmul %0, %1, %cst {dimension_numbers = #tpu.dot_dimension_numbers<[1], [0], [0], [1], [0, 0, 1, 1], [], []>} : vector<16x128xbf16>, vector<128x128xbf16>, vector<16x128xf32> -> vector<16x128xf32>
    %c0_3 = arith.constant 0 : index
    %c0_4 = arith.constant 0 : index
    %3 = vector.load %arg4[%c0_3, %c0_4] : memref<1x128xf32, #tpu.memory_space<vmem>>, vector<1x128xf32>
    %4 = vector.broadcast %3 : vector<1x128xf32> to vector<16x128xf32>
    %5 = arith.addf %2, %4 : vector<16x128xf32>
    %cst_5 = arith.constant 0.000000e+00 : f32
    %6 = vector.broadcast %cst_5 : f32 to vector<16x128xf32>
    %7 = arith.maximumf %5, %6 : vector<16x128xf32>
    %c0_6 = arith.constant 0 : index
    %c0_7 = arith.constant 0 : index
    %8 = vector.load %arg2[%c0_6, %c0_7] : memref<16x128xf32, #tpu.memory_space<vmem>>, vector<16x128xf32>
    %9 = arith.truncf %7 : vector<16x128xf32> to vector<16x128xbf16>
    %10 = arith.truncf %8 : vector<16x128xf32> to vector<16x128xbf16>
    %11 = tpu.concatenate %9, %10 in 1 : vector<16x128xbf16>, vector<16x128xbf16> -> vector<16x256xbf16>
    %c0_8 = arith.constant 0 : index
    %c0_9 = arith.constant 0 : index
    %12 = vector.load %arg5[%c0_8, %c0_9] : memref<256x512xbf16, #tpu.memory_space<vmem>>, vector<256x512xbf16>
    %cst_10 = arith.constant dense<0.000000e+00> : vector<16x512xf32>
    %13 = tpu.matmul %11, %12, %cst_10 {dimension_numbers = #tpu.dot_dimension_numbers<[1], [0], [0], [1], [0, 0, 1, 1], [], []>} : vector<16x256xbf16>, vector<256x512xbf16>, vector<16x512xf32> -> vector<16x512xf32>
    %c0_11 = arith.constant 0 : index
    %c0_12 = arith.constant 0 : index
    %14 = vector.load %arg6[%c0_11, %c0_12] : memref<1x512xf32, #tpu.memory_space<vmem>>, vector<1x512xf32>
    %15 = vector.broadcast %14 : vector<1x512xf32> to vector<16x512xf32>
    %16 = arith.addf %13, %15 : vector<16x512xf32>
    %17 = vector.extract_strided_slice %16 {offsets = [0, 0], sizes = [16, 128], strides = [1, 1]} : vector<16x512xf32> to vector<16x128xf32>
    %18 = arith.negf %17 : vector<16x128xf32>
    %19 = math.exp %18 : vector<16x128xf32>
    %cst_13 = arith.constant 1.000000e+00 : f32
    %20 = vector.broadcast %cst_13 : f32 to vector<16x128xf32>
    %21 = arith.addf %20, %19 : vector<16x128xf32>
    %22 = arith.divf %20, %21 : vector<16x128xf32>
    %23 = vector.extract_strided_slice %16 {offsets = [0, 128], sizes = [16, 128], strides = [1, 1]} : vector<16x512xf32> to vector<16x128xf32>
    %24 = arith.negf %23 : vector<16x128xf32>
    %25 = math.exp %24 : vector<16x128xf32>
    %cst_14 = arith.constant 1.000000e+00 : f32
    %26 = vector.broadcast %cst_14 : f32 to vector<16x128xf32>
    %27 = arith.addf %26, %25 : vector<16x128xf32>
    %28 = arith.divf %26, %27 : vector<16x128xf32>
    %29 = vector.extract_strided_slice %16 {offsets = [0, 256], sizes = [16, 128], strides = [1, 1]} : vector<16x512xf32> to vector<16x128xf32>
    %30 = vector.extract_strided_slice %16 {offsets = [0, 384], sizes = [16, 128], strides = [1, 1]} : vector<16x512xf32> to vector<16x128xf32>
    %31 = arith.mulf %22, %30 : vector<16x128xf32>
    %32 = arith.addf %29, %31 : vector<16x128xf32>
    %33 = math.tanh %32 : vector<16x128xf32>
    %cst_15 = arith.constant 1.000000e+00 : f32
    %34 = vector.broadcast %cst_15 : f32 to vector<16x128xf32>
    %35 = arith.subf %34, %28 : vector<16x128xf32>
    %36 = arith.mulf %35, %33 : vector<16x128xf32>
    %37 = arith.mulf %28, %8 : vector<16x128xf32>
    %38 = arith.addf %36, %37 : vector<16x128xf32>
    %39 = arith.truncf %38 : vector<16x128xf32> to vector<16x128xbf16>
    %c0_16 = arith.constant 0 : index
    %c0_17 = arith.constant 0 : index
    %40 = vector.load %arg7[%c0_16, %c0_17] : memref<128x128xbf16, #tpu.memory_space<vmem>>, vector<128x128xbf16>
    %cst_18 = arith.constant dense<0.000000e+00> : vector<16x128xf32>
    %41 = tpu.matmul %39, %40, %cst_18 {dimension_numbers = #tpu.dot_dimension_numbers<[1], [0], [0], [1], [0, 0, 1, 1], [], []>} : vector<16x128xbf16>, vector<128x128xbf16>, vector<16x128xf32> -> vector<16x128xf32>
    %c0_19 = arith.constant 0 : index
    %c0_20 = arith.constant 0 : index
    %42 = vector.load %arg8[%c0_19, %c0_20] : memref<1x128xf32, #tpu.memory_space<vmem>>, vector<1x128xf32>
    %43 = vector.broadcast %42 : vector<1x128xf32> to vector<16x128xf32>
    %44 = arith.addf %41, %43 : vector<16x128xf32>
    %c0_21 = arith.constant 0 : index
    %c0_22 = arith.constant 0 : index
    %45 = vector.load %arg9[%c0_21, %c0_22] : memref<16x128xf32, #tpu.memory_space<vmem>>, vector<16x128xf32>
    tpu.vector_store %arg9[%c0_21, %c0_22], %44 {strides = array<i32>} : memref<16x128xf32, #tpu.memory_space<vmem>>, vector<16x128xf32>,
    %c0_23 = arith.constant 0 : index
    %c0_24 = arith.constant 0 : index
    %46 = vector.load %arg10[%c0_23, %c0_24] : memref<16x128xf32, #tpu.memory_space<vmem>>, vector<16x128xf32>
    tpu.vector_store %arg10[%c0_23, %c0_24], %38 {strides = array<i32>} : memref<16x128xf32, #tpu.memory_space<vmem>>, vector<16x128xf32>,
    return
  }
  func.func @transform_0(%arg0: i32) -> (i32, i32) {
    %c0_i32 = arith.constant 0 : i32
    %c0_i32_0 = arith.constant 0 : i32
    return %arg0, %c0_i32 : i32, i32
  }
  func.func @transform_1(%arg0: i32) -> (i32, i32) {
    %c0_i32 = arith.constant 0 : i32
    %c0_i32_0 = arith.constant 0 : i32
    return %arg0, %c0_i32 : i32, i32
  }
  func.func @transform_2(%arg0: i32) -> (i32, i32) {
    %c0_i32 = arith.constant 0 : i32
    %c0_i32_0 = arith.constant 0 : i32
    %c0_i32_1 = arith.constant 0 : i32
    return %c0_i32, %c0_i32_0 : i32, i32
  }
  func.func @transform_3(%arg0: i32) -> (i32, i32) {
    %c0_i32 = arith.constant 0 : i32
    %c0_i32_0 = arith.constant 0 : i32
    %c0_i32_1 = arith.constant 0 : i32
    return %c0_i32, %c0_i32_0 : i32, i32
  }
  func.func @transform_4(%arg0: i32) -> (i32, i32) {
    %c0_i32 = arith.constant 0 : i32
    %c0_i32_0 = arith.constant 0 : i32
    %c0_i32_1 = arith.constant 0 : i32
    return %c0_i32, %c0_i32_0 : i32, i32
  }
  func.func @transform_5(%arg0: i32) -> (i32, i32) {
    %c0_i32 = arith.constant 0 : i32
    %c0_i32_0 = arith.constant 0 : i32
    %c0_i32_1 = arith.constant 0 : i32
    return %c0_i32, %c0_i32_0 : i32, i32
  }
  func.func @transform_6(%arg0: i32) -> (i32, i32) {
    %c0_i32 = arith.constant 0 : i32
    %c0_i32_0 = arith.constant 0 : i32
    %c0_i32_1 = arith.constant 0 : i32
    return %c0_i32, %c0_i32_0 : i32, i32
  }
  func.func @transform_7(%arg0: i32) -> (i32, i32) {
    %c0_i32 = arith.constant 0 : i32
    %c0_i32_0 = arith.constant 0 : i32
    %c0_i32_1 = arith.constant 0 : i32
    return %c0_i32, %c0_i32_0 : i32, i32
  }
  func.func @transform_8(%arg0: i32) -> (i32, i32) {
    %c0_i32 = arith.constant 0 : i32
    %c0_i32_0 = arith.constant 0 : i32
    return %arg0, %c0_i32 : i32, i32
  }
  func.func @transform_9(%arg0: i32) -> (i32, i32) {
    %c0_i32 = arith.constant 0 : i32
    %c0_i32_0 = arith.constant 0 : i32
    return %arg0, %c0_i32 : i32, i32
  }
}

</mosaic_0001>

<bundles_post_ra>
// kernel: tpu_custom_call.1
= control target key start
LH: loop header
LB: loop body
LE: loop exit
PB: predicated region body
PF: predicated region fallthrough
CT: control target
= control target key end

     0   :  { %15 = vsyncpa [#allocation3], 0  ;;  %s1677_s0 = inlined_call_operand.vmem [shape: bf16[16,128], index: 0, kind: input, shape index: {}]   ;;  %s1678_s1 = inlined_call_operand.hbm [shape: f32[16,128], index: 1, kind: input, shape index: {}, may-alias: {1,9}]   ;;  %s1679_s2 = inlined_call_operand.hbm [shape: bf16[128,128], index: 2, kind: input, shape index: {}]   ;;  %s1680_s3 = inlined_call_operand.vmem [shape: f32[1,128], index: 3, kind: input, shape index: {}]   ;;  %s1681_s4 = inlined_call_operand.hbm [shape: bf16[256,512], index: 4, kind: input, shape index: {}]   ;;  %s1682_s5 = inlined_call_operand.vmem [shape: f32[1,512], index: 5, kind: input, shape index: {}]   ;;  %s1683_s6 = inlined_call_operand.hbm [shape: bf16[128,128], index: 6, kind: input, shape index: {}]   ;;  %s1684_s7 = inlined_call_operand.vmem [shape: f32[1,128], index: 7, kind: input, shape index: {}]   ;;  %s1685_s8 = inlined_call_operand.hbm [shape: f32[16,128], index: 8, kind: output, shape index: {0}]   ;;  %s1686_s9 = inlined_call_operand.hbm [shape: f32[16,128], index: 9, kind: output, shape index: {1}, may-alias: {1,9}]  }
   0x1   :  { %16 = vsyncpa [#allocation6], 0 }
   0x2   :  { %17 = vsyncpa [#allocation9], 0 }
   0x3   :  { %18 = vsyncpa [#allocation4], 0  ;;  %s39_s11 = sshll.u32 %s1679_s2, 4  ;;  %s40_s11 = int_to_ptr.hbm [resolvable:$true] %s39_s11 }
   0x4   :  { %19 = vsyncpa [#allocation12], 0  ;;  %s1525_s12 = smov [#allocation5]   ;;  %s26_s16 = sshll.u32 %s1678_s1, 4  ;;  %s27_s16 = int_to_ptr.hbm [resolvable:$true] %s26_s16 }
   0x5   :  { %s41_s13 = sshll.u32 %s1525_s12, 4  ;;  %s1526_s17 = smov 64   ;;  %s42_s13 = int_to_ptr.vmem [resolvable:$true] %s41_s13 }
   0x6   :  { %s1527_s18 = smov 4   ;;  %s1528_s19 = smov [#allocation2]  }
   0x7   :  { %47 = dma.hbm_to_vmem [thread:$0]  %s40_s11, 1024, %s42_s13, [#allocation6], %s1526_s17, %s1526_s17, %s1527_s18  }
   0x8   :  { %s28_s20 = sshll.u32 %s1528_s19, 4  ;;  %s1529_s21 = smov 128   ;;  %s29_s20 = int_to_ptr.vmem [resolvable:$true] %s28_s20 }
   0x9   :  { %s1530_s22 = smov 8   ;;  %s54_s24 = sshll.u32 %s1681_s4, 4  ;;  %s55_s24 = int_to_ptr.hbm [resolvable:$true] %s54_s24 }
   0xa   :  { %34 = dma.hbm_to_vmem [thread:$0]  %s27_s16, 256, %s29_s20, [#allocation3], %s1529_s21, %s1529_s21, %s1530_s22  }
   0xb   :  { %s1531_s25 = smov [#allocation7]   ;;  %s69_s28 = sshll.u32 %s1683_s6, 4  ;;  %s70_s28 = int_to_ptr.hbm [resolvable:$true] %s69_s28 }
   0xc   :  { %s56_s1 = sshll.u32 %s1531_s25, 4  ;;  %s1532_s29 = smov 256   ;;  %s57_s1 = int_to_ptr.vmem [resolvable:$true] %s56_s1 }
   0xd   :  { %s1533_s30 = smov 16   ;;  %s1534_s10 = smov [#allocation8]  }
   0xe   :  { %62 = dma.hbm_to_vmem [thread:$0]  %s55_s24, 8192, %s57_s1, [#allocation6], %s1532_s29, %s1532_s29, %s1533_s30  }
   0xf   :  { %s71_s11 = sshll.u32 %s1534_s10, 4  ;;  %s72_s11 = int_to_ptr.vmem [resolvable:$true] %s71_s11 }
  0x10   :  { %77 = dma.hbm_to_vmem [thread:$0]  %s70_s28, 1024, %s72_s11, [#allocation9], %s1526_s17, %s1526_s17, %s1527_s18  }
  0x11   :  { %1515 = dma.done.wait [#allocation3], 256  }
  0x12   :  { %1516 = vsyncadd [#allocation3], 4294967040 }
  0x13   :  { %1517 = dma.done.wait [#allocation6], 9216  }
  0x14   :  { %1518 = vsyncadd [#allocation6], 4294958080 }
  0x15   :  { %1519 = dma.done.wait [#allocation9], 1024  }
  0x16   :  { %1520 = vsyncadd [#allocation9], 4294966272  ;;  %v1264_v0 = vld [vmem:[#allocation5 + $0x38] sm:$0xff]  ;;  %v1263_v1 = vld [vmem:[#allocation5 + $0x30] sm:$0xff]  ;;  %s908_s17 = sshll.u32 %s1686_s9, 4  ;;  %s1536_s20 = smov [#allocation10]   ;;  %s909_s17 = int_to_ptr.hbm [resolvable:$true] %s908_s17 }
  0x17   :  { %172 = vmatpush.bf16.msra.mxu0 %v1264_v0  ;;  %v1206_v2 = vld [vmem:[#allocation7 + $0x1e0] sm:$0xf]  ;;  %v1327_v3 = vld [vmem:[#allocation7 + $0x1ec] sm:$0xf0]  ;;  %v1293_v10 = vld [vmem:[#allocation7 + $0xe4] sm:$0xf] }
  0x18   :  { %v1078_v4 = vld [vmem:[#allocation7 + $0xe0] sm:$0xf]  ;;  %v1207_v5 = vor.u32 %v1327_v3, %v1206_v2  ;;  %v1295_v6 = vld [vmem:[#allocation7 + $0xec] sm:$0xf0]  ;;  %v1080_v11 = vld [vmem:[#allocation7 + $0xf0] sm:$0xf0] }
  0x19   :  { %v1190_v7 = vld [vmem:[#allocation7 + $0x1c0] sm:$0xf]  ;;  %v1323_v8 = vld [vmem:[#allocation7 + $0x1cc] sm:$0xf0]  ;;  %v1079_v9 = vor.u32 %v1295_v6, %v1078_v4  ;;  %v1262_v13 = vld [vmem:[#allocation5 + $0x28] sm:$0xff]  ;;  %v1083_v15 = vor.u32 %v1293_v10, %v1080_v11  ;;  %s893_s2 = sshll.u32 %s1536_s20, 4  ;;  %s894_s2 = int_to_ptr.vmem [resolvable:$true] %s893_s2 }
  0x1a   :  { %v1062_v12 = vld [vmem:[#allocation7 + $0xc0] sm:$0xf]  ;;  %614 = vmatpush.bf16.msra.mxu2 %v1207_v5  ;;  %v1191_v14 = vor.u32 %v1323_v8, %v1190_v7  ;;  %v1291_v16 = vld [vmem:[#allocation7 + $0xcc] sm:$0xf0]  ;;  %v1289_v20 = vld [vmem:[#allocation7 + $0xc4] sm:$0xf] }
  0x1b   :  { %173 = vmatpush.bf16.msra.mxu0 %v1263_v1  ;;  %v1174_v17 = vld [vmem:[#allocation7 + $0x1a0] sm:$0xf]  ;;  %600 = vmatpush.bf16.msra.mxu1 %v1079_v9  ;;  %v1063_v18 = vor.u32 %v1291_v16, %v1062_v12  ;;  %v1319_v19 = vld [vmem:[#allocation7 + $0x1ac] sm:$0xf0]  ;;  %v1064_v21 = vld [vmem:[#allocation7 + $0xd0] sm:$0xf0] }
  0x1c   :  { %628 = vmatpush.bf16.msra.mxu3 %v1083_v15  ;;  %v1067_v22 = vor.u32 %v1289_v20, %v1064_v21  ;;  %v1046_v23 = vld [vmem:[#allocation7 + $0xa0] sm:$0xf]  ;;  %v1287_v24 = vld [vmem:[#allocation7 + $0xac] sm:$0xf0]  ;;  %v1285_v25 = vld [vmem:[#allocation7 + $0xa4] sm:$0xf]  ;;  %v1175_v27 = vor.u32 %v1319_v19, %v1174_v17 }
  0x1d   :  { %v1261_v26 = vld [vmem:[#allocation5 + $0x20] sm:$0xff]  ;;  %v1048_v28 = vld [vmem:[#allocation7 + $0xb0] sm:$0xf0]  ;;  %v1047_v29 = vor.u32 %v1287_v24, %v1046_v23  ;;  %v1315_v31 = vld [vmem:[#allocation7 + $0x18c] sm:$0xf0]  ;;  %s895_s25 = sshll.u32 %s1685_s8, 4  ;;  %s896_s25 = int_to_ptr.hbm [resolvable:$true] %s895_s25 }
  0x1e   :  { %615 = vmatpush.bf16.msra.mxu2 %v1191_v14  ;;  %v1158_v30 = vld [vmem:[#allocation7 + $0x180] sm:$0xf]  ;;  %v1051_v32 = vor.u32 %v1285_v25, %v1048_v28  ;;  %v1283_v34 = vld [vmem:[#allocation7 + $0x8c] sm:$0xf0]  ;;  %v1281_v35 = vld [vmem:[#allocation7 + $0x84] sm:$0xf] }
  0x1f   :  { %174 = vmatpush.bf16.msra.mxu0 %v1262_v13  ;;  %601 = vmatpush.bf16.msra.mxu1 %v1063_v18  ;;  %v1030_v33 = vld [vmem:[#allocation7 + $0x80] sm:$0xf]  ;;  %v1032_v36 = vld [vmem:[#allocation7 + $0x90] sm:$0xf0]  ;;  %v1260_v37 = vld [vmem:[#allocation5 + $0x18] sm:$0xff]  ;;  %v1159_v38 = vor.u32 %v1315_v31, %v1158_v30 }
  0x20   :  { %629 = vmatpush.bf16.msra.mxu3 %v1067_v22  ;;  %v1031_v39 = vor.u32 %v1283_v34, %v1030_v33  ;;  %v1142_v40 = vld [vmem:[#allocation7 + $0x160] sm:$0xf]  ;;  %v1311_v41 = vld [vmem:[#allocation7 + $0x16c] sm:$0xf0]  ;;  %v1035_v42 = vor.u32 %v1281_v35, %v1032_v36  ;;  %v1277_v45 = vld [vmem:[#allocation7 + $0x64] sm:$0xf] }
  0x21   :  { %v1014_v43 = vld [vmem:[#allocation7 + $0x60] sm:$0xf]  ;;  %v1279_v44 = vld [vmem:[#allocation7 + $0x6c] sm:$0xf0]  ;;  %v1016_v46 = vld [vmem:[#allocation7 + $0x70] sm:$0xf0]  ;;  %v1143_v48 = vor.u32 %v1311_v41, %v1142_v40 }
  0x22   :  { %616 = vmatpush.bf16.msra.mxu2 %v1175_v27  ;;  %v1259_v47 = vld [vmem:[#allocation5 + $0x10] sm:$0xff]  ;;  %v1015_v49 = vor.u32 %v1279_v44, %v1014_v43  ;;  %v1126_v50 = vld [vmem:[#allocation7 + $0x140] sm:$0xf]  ;;  %v1019_v52 = vor.u32 %v1277_v45, %v1016_v46  ;;  %v1273_v55 = vld [vmem:[#allocation7 + $0x44] sm:$0xf] }
  0x23   :  { %175 = vmatpush.bf16.msra.mxu0 %v1261_v26  ;;  %602 = vmatpush.bf16.msra.mxu1 %v1047_v29  ;;  %v1307_v51 = vld [vmem:[#allocation7 + $0x14c] sm:$0xf0]  ;;  %v998_v53 = vld [vmem:[#allocation7 + $0x40] sm:$0xf]  ;;  %v1000_v56 = vld [vmem:[#allocation7 + $0x50] sm:$0xf0] }
  0x24   :  { %630 = vmatpush.bf16.msra.mxu3 %v1051_v32  ;;  %v1275_v54 = vld [vmem:[#allocation7 + $0x4c] sm:$0xf0]  ;;  %v1258_v57 = vld [vmem:[#allocation5 + $0x8] sm:$0xff]  ;;  %v1127_v58 = vor.u32 %v1307_v51, %v1126_v50  ;;  %v1325_v59 = vld [vmem:[#allocation7 + $0x1e4] sm:$0xf]  ;;  %v1003_v0 = vor.u32 %v1273_v55, %v1000_v56 }
  0x25   :  { %v999_v60 = vor.u32 %v1275_v54, %v998_v53  ;;  %v1110_v61 = vld [vmem:[#allocation7 + $0x120] sm:$0xf]  ;;  %v1303_v62 = vld [vmem:[#allocation7 + $0x12c] sm:$0xf0]  ;;  %v1208_v63 = vld [vmem:[#allocation7 + $0x1f0] sm:$0xf0] }
  0x26   :  { %617 = vmatpush.bf16.msra.mxu2 %v1159_v38  ;;  %v982_v1 = vld [vmem:[#allocation7 + $0x20] sm:$0xf]  ;;  %v1271_v2 = vld [vmem:[#allocation7 + $0x2c] sm:$0xf0]  ;;  %v1269_v3 = vld [vmem:[#allocation7 + $0x24] sm:$0xf]  ;;  %v1111_v6 = vor.u32 %v1303_v62, %v1110_v61  ;;  %v1211_v7 = vor.u32 %v1325_v59, %v1208_v63 }
  0x27   :  { %176 = vmatpush.bf16.msra.mxu0 %v1260_v37  ;;  %603 = vmatpush.bf16.msra.mxu1 %v1031_v39  ;;  %v984_v4 = vld [vmem:[#allocation7 + $0x30] sm:$0xf0]  ;;  %v1257_v5 = vld [vmem:[#allocation5] sm:$0xff]  ;;  %v983_v8 = vor.u32 %v1271_v2, %v982_v1  ;;  %v1299_v10 = vld [vmem:[#allocation7 + $0x10c] sm:$0xf0] }
  0x28   :  { %631 = vmatpush.bf16.msra.mxu3 %v1035_v42  ;;  %v1094_v9 = vld [vmem:[#allocation7 + $0x100] sm:$0xf]  ;;  %v1321_v11 = vld [vmem:[#allocation7 + $0x1c4] sm:$0xf]  ;;  %v1192_v12 = vld [vmem:[#allocation7 + $0x1d0] sm:$0xf0]  ;;  %v987_v13 = vor.u32 %v1269_v3, %v984_v4 }
  0x29   :  { %v1256_v14 = vld [vmem:[%s1677_s0] sm:$0xff]  ;;  %v1095_v15 = vor.u32 %v1299_v10, %v1094_v9  ;;  %v1195_v16 = vor.u32 %v1321_v11, %v1192_v12  ;;  %v1317_v17 = vld [vmem:[#allocation7 + $0x1a4] sm:$0xf]  ;;  %v1214_v26 = vld [vmem:[#allocation7 + $0x1e8] sm:$0xf] }
  0x2a   :  { %618 = vmatpush.bf16.msra.mxu2 %v1143_v48  ;;  %v1176_v18 = vld [vmem:[#allocation7 + $0x1b0] sm:$0xf0]  ;;  %v1313_v20 = vld [vmem:[#allocation7 + $0x184] sm:$0xf]  ;;  %v1328_v27 = vld [vmem:[#allocation7 + $0x1f4] sm:$0xf0] }
  0x2b   :  { %177 = vmatpush.bf16.msra.mxu0 %v1259_v47  ;;  %604 = vmatpush.bf16.msra.mxu1 %v1015_v49  ;;  %v1179_v19 = vor.u32 %v1317_v17, %v1176_v18  ;;  %v1160_v21 = vld [vmem:[#allocation7 + $0x190] sm:$0xf0]  ;;  %v1309_v23 = vld [vmem:[#allocation7 + $0x164] sm:$0xf]  ;;  %v1215_v28 = vor.u32 %v1328_v27, %v1214_v26  ;;  %v966_v32 = vld [vmem:[#allocation7] sm:$0xf] }
  0x2c   :  { %632 = vmatpush.bf16.msra.mxu3 %v1019_v52  ;;  %v1163_v22 = vor.u32 %v1313_v20, %v1160_v21  ;;  %v1144_v24 = vld [vmem:[#allocation7 + $0x170] sm:$0xf0]  ;;  %v1305_v29 = vld [vmem:[#allocation7 + $0x144] sm:$0xf]  ;;  %v1267_v33 = vld [vmem:[#allocation7 + $0xc] sm:$0xf0] }
  0x2d   :  { %v1147_v25 = vor.u32 %v1309_v23, %v1144_v24  ;;  %v1128_v30 = vld [vmem:[#allocation7 + $0x150] sm:$0xf0]  ;;  %v1265_v34 = vld [vmem:[#allocation7 + $0x4] sm:$0xf]  ;;  %v967_v35 = vor.u32 %v1267_v33, %v966_v32  ;;  %v1086_v37 = vld [vmem:[#allocation7 + $0xe8] sm:$0xf] }
  0x2e   :  { %619 = vmatpush.bf16.msra.mxu2 %v1127_v58  ;;  %v1131_v31 = vor.u32 %v1305_v29, %v1128_v30  ;;  %v968_v36 = vld [vmem:[#allocation7 + $0x10] sm:$0xf0]  ;;  %v1296_v38 = vld [vmem:[#allocation7 + $0xf4] sm:$0xf0]  ;;  %v1198_v41 = vld [vmem:[#allocation7 + $0x1c8] sm:$0xf] }
  0x2f   :  { %178 = vmatpush.bf16.msra.mxu0 %v1258_v57  ;;  %605 = vmatpush.bf16.msra.mxu1 %v999_v60  ;;  %v971_v39 = vor.u32 %v1265_v34, %v968_v36  ;;  %v1087_v40 = vor.u32 %v1296_v38, %v1086_v37  ;;  %v1324_v42 = vld [vmem:[#allocation7 + $0x1d4] sm:$0xf0]  ;;  %v1294_v43 = vld [vmem:[#allocation7 + $0xec] sm:$0xf]  ;;  %v1088_v45 = vld [vmem:[#allocation7 + $0xf8] sm:$0xf0] }
  0x30   :  { %633 = vmatpush.bf16.msra.mxu3 %v1003_v0  ;;  %v1199_v44 = vor.u32 %v1324_v42, %v1198_v41  ;;  %v1301_v46 = vld [vmem:[#allocation7 + $0x124] sm:$0xf]  ;;  %v1112_v47 = vld [vmem:[#allocation7 + $0x130] sm:$0xf0]  ;;  %v1091_v48 = vor.u32 %v1294_v43, %v1088_v45  ;;  %v1607_v51 = vld [vmem:[#allocation2 + $0x8] sm:$0xff] }
  0x31   :  { %v1115_v49 = vor.u32 %v1301_v46, %v1112_v47  ;;  %v1605_v50 = vld [vmem:[#allocation2] sm:$0xff]  ;;  %v193_v53 = vpack.c.bf16 %v1607_v51, %v1607_v51  ;;  %v1070_v54 = vld [vmem:[#allocation7 + $0xc8] sm:$0xf]  ;;  %v1292_v55 = vld [vmem:[#allocation7 + $0xd4] sm:$0xf0] }
  0x32   :  { %620 = vmatpush.bf16.msra.mxu2 %v1111_v6  ;;  %v192_v52 = vpack.c.bf16 %v1605_v50, %v1605_v50  ;;  %v1182_v56 = vld [vmem:[#allocation7 + $0x1a8] sm:$0xf]  ;;  %v1071_v57 = vor.u32 %v1292_v55, %v1070_v54  ;;  %v1320_v58 = vld [vmem:[#allocation7 + $0x1b4] sm:$0xf0]  ;;  %v1290_v59 = vld [vmem:[#allocation7 + $0xcc] sm:$0xf] }
  0x33   :  { %179 = vmatpush.bf16.msra.mxu0 %v1257_v5  ;;  %606 = vmatpush.bf16.msra.mxu1 %v983_v8  ;;  %v1072_v60 = vld [vmem:[#allocation7 + $0xd8] sm:$0xf0]  ;;  %v203_v62 = vunpack.c.l.b16 %v193_v53  ;;  %v1183_v63 = vor.u32 %v1320_v58, %v1182_v56  ;;  %v1297_v1 = vld [vmem:[#allocation7 + $0x104] sm:$0xf]  ;;  %v1096_v2 = vld [vmem:[#allocation7 + $0x110] sm:$0xf0] }
  0x34   :  { %634 = vmatpush.bf16.msra.mxu3 %v987_v13  ;;  %v202_v61 = vunpack.c.l.b16 %v192_v52  ;;  %v1075_v0 = vor.u32 %v1290_v59, %v1072_v60  ;;  %v1326_v3 = vld [vmem:[#allocation7 + $0x1ec] sm:$0xf]  ;;  %v1099_v4 = vor.u32 %v1297_v1, %v1096_v2  ;;  %v1216_v5 = vld [vmem:[#allocation7 + $0x1f8] sm:$0xf0]  ;;  %v1054_v8 = vld [vmem:[#allocation7 + $0xa8] sm:$0xf] }
  0x35   :  { %v1288_v9 = vld [vmem:[#allocation7 + $0xb4] sm:$0xf0]  ;;  %v1166_v10 = vld [vmem:[#allocation7 + $0x188] sm:$0xf]  ;;  %v1286_v13 = vld [vmem:[#allocation7 + $0xac] sm:$0xf] }
  0x36   :  { %180 = vmatmul.bf16.vlgmr.msra.gmra.mxu0 %v1256_v14  ;;  %621 = vmatpush.bf16.msra.mxu2 %v1095_v15  ;;  %v1613_v6 = vpack.c.b16 %v203_v62, %v202_v61  ;;  %v1055_v11 = vor.u32 %v1288_v9, %v1054_v8  ;;  %v1316_v12 = vld [vmem:[#allocation7 + $0x194] sm:$0xf0]  ;;  %v1056_v14 = vld [vmem:[#allocation7 + $0xb8] sm:$0xf0]  ;;  %v1322_v17 = vld [vmem:[#allocation7 + $0x1cc] sm:$0xf] }
  0x37   :  { %642 = vmatpush.bf16.msrb.mxu0 %v1211_v7  ;;  %607 = vmatpush.bf16.msra.mxu1 %v967_v35  ;;  %v1219_v7 = vor.u32 %v1326_v3, %v1216_v5  ;;  %v1167_v15 = vor.u32 %v1316_v12, %v1166_v10  ;;  %v1200_v18 = vld [vmem:[#allocation7 + $0x1d8] sm:$0xf0]  ;;  %v1038_v20 = vld [vmem:[#allocation7 + $0x88] sm:$0xf]  ;;  %v1284_v21 = vld [vmem:[#allocation7 + $0x94] sm:$0xf0] }
  0x38   :  { %635 = vmatpush.bf16.msra.mxu3 %v971_v39  ;;  %v1039_v23 = vor.u32 %v1284_v21, %v1038_v20  ;;  %v1312_v24 = vld [vmem:[#allocation7 + $0x174] sm:$0xf0]  ;;  %v1040_v26 = vld [vmem:[#allocation7 + $0x98] sm:$0xf0]  ;;  %v1318_v29 = vld [vmem:[#allocation7 + $0x1ac] sm:$0xf] }
  0x39   :  { %622 = vmatmul.bf16.vlgmr.msra.gmra.mxu2 %v1613_v6  ;;  %v1184_v30 = vld [vmem:[#allocation7 + $0x1b8] sm:$0xf0]  ;;  %v1022_v32 = vld [vmem:[#allocation7 + $0x68] sm:$0xf]  ;;  %v1280_v33 = vld [vmem:[#allocation7 + $0x74] sm:$0xf0] }
  0x3a   :  { %670 = vmatpush.bf16.msrb.mxu2 %v1215_v28  ;;  %v1134_v34 = vld [vmem:[#allocation7 + $0x148] sm:$0xf]  ;;  %v1023_v35 = vor.u32 %v1280_v33, %v1022_v32  ;;  %v1308_v36 = vld [vmem:[#allocation7 + $0x154] sm:$0xf0]  ;;  %v1278_v37 = vld [vmem:[#allocation7 + $0x6c] sm:$0xf] }
  0x3b   :  { %643 = vmatpush.bf16.msrb.mxu0 %v1195_v16  ;;  %656 = vmatpush.bf16.msrb.mxu1 %v1087_v40  ;;  %v1059_v16 = vor.u32 %v1286_v13, %v1056_v14  ;;  %v1024_v38 = vld [vmem:[#allocation7 + $0x78] sm:$0xf0]  ;;  %v1135_v39 = vor.u32 %v1308_v36, %v1134_v34  ;;  %v1314_v41 = vld [vmem:[#allocation7 + $0x18c] sm:$0xf]  ;;  %v1006_v43 = vld [vmem:[#allocation7 + $0x48] sm:$0xf] }
  0x3c   :  { %684 = vmatpush.bf16.msrb.mxu3 %v1091_v48  ;;  %v1027_v40 = vor.u32 %v1278_v37, %v1024_v38  ;;  %v1168_v42 = vld [vmem:[#allocation7 + $0x198] sm:$0xf0]  ;;  %v1276_v45 = vld [vmem:[#allocation7 + $0x54] sm:$0xf0]  ;;  %v1118_v46 = vld [vmem:[#allocation7 + $0x128] sm:$0xf] }
  0x3d   :  { %v1304_v47 = vld [vmem:[#allocation7 + $0x134] sm:$0xf0]  ;;  %v1007_v48 = vor.u32 %v1276_v45, %v1006_v43  ;;  %v1274_v52 = vld [vmem:[#allocation7 + $0x4c] sm:$0xf]  ;;  %v1008_v53 = vld [vmem:[#allocation7 + $0x58] sm:$0xf0] }
  0x3e   :  { %671 = vmatpush.bf16.msrb.mxu2 %v1199_v44  ;;  %v1171_v44 = vor.u32 %v1314_v41, %v1168_v42  ;;  %v1310_v54 = vld [vmem:[#allocation7 + $0x16c] sm:$0xf]  ;;  %v1011_v55 = vor.u32 %v1274_v52, %v1008_v53  ;;  %v1152_v56 = vld [vmem:[#allocation7 + $0x178] sm:$0xf0]  ;;  %v1272_v58 = vld [vmem:[#allocation7 + $0x34] sm:$0xf0] }
  0x3f   :  { %644 = vmatpush.bf16.msrb.mxu0 %v1179_v19  ;;  %657 = vmatpush.bf16.msrb.mxu1 %v1071_v57  ;;  %v1203_v19 = vor.u32 %v1322_v17, %v1200_v18  ;;  %v990_v57 = vld [vmem:[#allocation7 + $0x28] sm:$0xf]  ;;  %v1155_v59 = vor.u32 %v1310_v54, %v1152_v56  ;;  %v1300_v61 = vld [vmem:[#allocation7 + $0x114] sm:$0xf0]  ;;  %v1270_v62 = vld [vmem:[#allocation7 + $0x2c] sm:$0xf] }
  0x40   :  { %685 = vmatpush.bf16.msrb.mxu3 %v1075_v0  ;;  %v1102_v60 = vld [vmem:[#allocation7 + $0x108] sm:$0xf]  ;;  %v992_v0 = vld [vmem:[#allocation7 + $0x38] sm:$0xf0]  ;;  %v1306_v1 = vld [vmem:[#allocation7 + $0x14c] sm:$0xf] }
  0x41   :  { %v1136_v2 = vld [vmem:[#allocation7 + $0x158] sm:$0xf0]  ;;  %v1103_v3 = vor.u32 %v1300_v61, %v1102_v60  ;;  %v1268_v5 = vld [vmem:[#allocation7 + $0x14] sm:$0xf0]  ;;  %v1266_v9 = vld [vmem:[#allocation7 + $0xc] sm:$0xf] }
  0x42   :  { %672 = vmatpush.bf16.msrb.mxu2 %v1183_v63  ;;  %v991_v63 = vor.u32 %v1272_v58, %v990_v57  ;;  %v1139_v8 = vor.u32 %v1306_v1, %v1136_v2  ;;  %v976_v10 = vld [vmem:[#allocation7 + $0x18] sm:$0xf0]  ;;  %v1302_v12 = vld [vmem:[#allocation7 + $0x12c] sm:$0xf]  ;;  %v1625_v32 = vld [vmem:[%s1682_s5] sm:$0xf] }
  0x43   :  { %645 = vmatpush.bf16.msrb.mxu0 %v1163_v22  ;;  %658 = vmatpush.bf16.msrb.mxu1 %v1055_v11  ;;  %v1150_v22 = vld [vmem:[#allocation7 + $0x168] sm:$0xf]  ;;  %v1120_v13 = vld [vmem:[#allocation7 + $0x138] sm:$0xf0]  ;;  %v979_v14 = vor.u32 %v1266_v9, %v976_v10  ;;  %v272_v33 = vperm.slane %v1625_v32, 0  ;;  %v1333_v43 = vld [vmem:[#allocation8 + $0x20] sm:$0xff] }
  0x44   :  { %686 = vmatpush.bf16.msrb.mxu3 %v1059_v16  ;;  %v1151_v27 = vor.u32 %v1312_v24, %v1150_v22  ;;  %v1123_v16 = vor.u32 %v1302_v12, %v1120_v13  ;;  %v1104_v20 = vld [vmem:[#allocation7 + $0x118] sm:$0xf0]  ;;  %v1334_v37 = vld [vmem:[#allocation8 + $0x28] sm:$0xff]  ;;  %v1331_v56 = vld [vmem:[#allocation8 + $0x10] sm:$0xff]  ;;  %v275_v9 = vperm.slane %v1625_v32, 3  ;;  %s1535_s5 = smov [#allocation11]  }
  0x45   :  { %v1330_v61 = vld [vmem:[#allocation8 + $0x8] sm:$0xff]  ;;  %v1329_v2 = vld [vmem:[#allocation8] sm:$0xff]  ;;  %s906_s14 = sshll.u32 %s1535_s5, 4  ;;  %s907_s14 = int_to_ptr.vmem [resolvable:$true] %s906_s14 }
  0x46   :  { %673 = vmatpush.bf16.msrb.mxu2 %v1167_v15  ;;  %v1349_v15 = vld [vmem:[%s1680_s3] ss:$0 sm:$0xff] }
  0x47   :  { %646 = vmatpush.bf16.msrb.mxu0 %v1147_v25  ;;  %v1282_v25 = vld [vmem:[#allocation7 + $0x8c] sm:$0xf]  ;;  %659 = vmatpush.bf16.msrb.mxu1 %v1039_v23 }
  0x48   :  { %v1043_v28 = vor.u32 %v1282_v25, %v1040_v26 }
  0x4a   :  { %674 = vmatpush.bf16.msrb.mxu2 %v1151_v27  ;;  %687 = vmatpush.bf16.msrb.mxu3 %v1043_v28 }
  0x4b   :  { %647 = vmatpush.bf16.msrb.mxu0 %v1131_v31  ;;  %v1187_v31 = vor.u32 %v1318_v29, %v1184_v30  ;;  %660 = vmatpush.bf16.msrb.mxu1 %v1023_v35 }
  0x4e   :  { %675 = vmatpush.bf16.msrb.mxu2 %v1135_v39  ;;  %688 = vmatpush.bf16.msrb.mxu3 %v1027_v40  ;;  %v273_v39 = vperm.slane %v1625_v32, 1 }
  0x4f   :  { %648 = vmatpush.bf16.msrb.mxu0 %v1115_v49  ;;  %v1119_v49 = vor.u32 %v1304_v47, %v1118_v46  ;;  %661 = vmatpush.bf16.msrb.mxu1 %v1007_v48 }
  0x52   :  { %676 = vmatpush.bf16.msrb.mxu2 %v1119_v49  ;;  %689 = vmatpush.bf16.msrb.mxu3 %v1011_v55  ;;  %v1332_v49 = vld [vmem:[#allocation8 + $0x18] sm:$0xff] }
  0x53   :  { %649 = vmatpush.bf16.msrb.mxu0 %v1099_v4  ;;  %v974_v4 = vld [vmem:[#allocation7 + $0x8] sm:$0xf]  ;;  %662 = vmatpush.bf16.msrb.mxu1 %v991_v63 }
  0x54   :  { %v975_v11 = vor.u32 %v1268_v5, %v974_v4 }
  0x56   :  { %650 = vmatmul.bf16.vlgmr.msrb.gmra.mxu0 %v1613_v6  ;;  %677 = vmatpush.bf16.msrb.mxu2 %v1103_v3 }
  0x57   :  { %698 = vmatpush.bf16.msra.mxu0 %v1219_v7  ;;  %v995_v7 = vor.u32 %v1270_v62, %v992_v0  ;;  %663 = vmatpush.bf16.msrb.mxu1 %v975_v11  ;;  %v274_v11 = vperm.slane %v1625_v32, 2 }
  0x59   :  { %690 = vmatpush.bf16.msrb.mxu3 %v995_v7  ;;  %678 = vmatmul.bf16.vlgmr.msrb.gmra.mxu2 %v1613_v6 }
  0x5b   :  { %699 = vmatpush.bf16.msra.mxu0 %v1203_v19  ;;  %v1298_v19 = vld [vmem:[#allocation7 + $0x10c] sm:$0xf] }
  0x5c   :  { %v1107_v21 = vor.u32 %v1298_v19, %v1104_v20 }
  0x5d   :  { %691 = vmatpush.bf16.msrb.mxu3 %v979_v14 }
  0x5f   :  { %700 = vmatpush.bf16.msra.mxu0 %v1187_v31  ;;  %v1336_v31 = vld [vmem:[#allocation8 + $0x38] sm:$0xff] }
  0x63   :  { %701 = vmatpush.bf16.msra.mxu0 %v1171_v44 }
  0x67   :  { %702 = vmatpush.bf16.msra.mxu0 %v1155_v59 }
  0x6b   :  { %703 = vmatpush.bf16.msra.mxu0 %v1139_v8 }
  0x6f   :  { %704 = vmatpush.bf16.msra.mxu0 %v1123_v16 }
  0x73   :  { %705 = vmatpush.bf16.msra.mxu0 %v1107_v21 }
  0x76   :  { %706 = vmatmul.bf16.vlgmr.msra.gmra.mxu0 %v1613_v6  ;;  %v1335_v6 = vld [vmem:[#allocation8 + $0x30] sm:$0xff] }
  0xb3   :  { %v181_v17 = vpop.f32.mrf.mxu0 }
  0xb4   :  { %v182_v18 = vadd.f32 %v1349_v15, %v181_v17 }
  0xb6   :  { %v186_v22 = vmax.f32 %v182_v18, 0.0 }
  0xb8   :  { %v190_v25 = vpack.c.bf16 %v186_v22, %v186_v22 }
  0xba   :  { %v196_v28 = vunpack.c.l.b16 %v190_v25 }
  0xbb   :  { %v183_v23 = vpop.f32.mrf.mxu0 }
  0xbc   :  { %v184_v24 = vadd.f32 %v1349_v15, %v183_v23  ;;  %v623_v34 = vpop.f32.mrf.mxu2 }
  0xbe   :  { %v187_v26 = vmax.f32 %v184_v24, 0.0 }
  0xc0   :  { %v191_v27 = vpack.c.bf16 %v187_v26, %v187_v26 }
  0xc2   :  { %v197_v29 = vunpack.c.l.b16 %v191_v27 }
  0xc4   :  { %v198_v30 = vpack.c.b16 %v197_v29, %v196_v28  ;;  %v625_v48 = vpop.f32.mrf.mxu2 }
  0xc6   :  { %608 = vmatmul.bf16.vlgmr.msra.gmra.mxu1 %v198_v30  ;;  %636 = vmatmul.bf16.vlgmr.msra.gmra.mxu3 %v198_v30 }
  0xc7   :  { %871 = vmatpush.bf16.msra.mxu1 %v1336_v31 }
  0xcb   :  { %872 = vmatpush.bf16.msra.mxu1 %v1335_v6 }
  0xcf   :  { %873 = vmatpush.bf16.msra.mxu1 %v1334_v37 }
  0xd3   :  { %v651_v41 = vpop.f32.mrf.mxu0  ;;  %874 = vmatpush.bf16.msra.mxu1 %v1333_v43 }
  0xd6   :  { %664 = vmatmul.bf16.vlgmr.msrb.gmra.mxu1 %v198_v30  ;;  %692 = vmatmul.bf16.vlgmr.msrb.gmra.mxu3 %v198_v30 }
  0xd7   :  { %875 = vmatpush.bf16.msra.mxu1 %v1332_v49 }
  0xdb   :  { %v653_v60 = vpop.f32.mrf.mxu0  ;;  %876 = vmatpush.bf16.msra.mxu1 %v1331_v56 }
  0xdc   :  { %v679_v16 = vpop.f32.mrf.mxu2 }
  0xdf   :  { %877 = vmatpush.bf16.msra.mxu1 %v1330_v61 }
  0xe3   :  { %878 = vmatpush.bf16.msra.mxu1 %v1329_v2 }
  0xf3   :  { %v707_v22 = vpop.f32.mrf.mxu0 }
 0x143   :  { %v609_v35 = vpop.f32.mrf.mxu1 }
 0x144   :  { %v610_v36 = vadd.f32 %v609_v35, %v272_v33 }
 0x146   :  { %v624_v38 = vadd.f32 %v623_v34, %v610_v36 }
 0x148   :  { %v1220_v40 = vmul.f32 -1.442695, %v624_v38 }
 0x149   :  { %v637_v42 = vpop.f32.mrf.mxu3 }
 0x14a   :  { %1351 = vpow2.f32 %v1220_v40  ;;  %v638_v44 = vadd.f32 %v637_v42, %v273_v39 }
 0x14b   :  { %v611_v45 = vpop.f32.mrf.mxu1 }
 0x14c   :  { %v652_v46 = vadd.f32 %v651_v41, %v638_v44  ;;  %v612_v47 = vadd.f32 %v611_v45, %v272_v33 }
 0x14e   :  { %v1222_v52 = vmul.f32 -1.442695, %v652_v46  ;;  %v626_v53 = vadd.f32 %v625_v48, %v612_v47 }
 0x150   :  { %v1352_v54 = vpop.eup %1351  ;;  %1353 = vpow2.f32 %v1222_v52  ;;  %v1221_v55 = vmul.f32 -1.442695, %v626_v53  ;;  %v681_v52 = vpop.f32.mrf.mxu2 }
 0x151   :  { %v718_v57 = vadd.f32 1.0, %v1352_v54  ;;  %v639_v58 = vpop.f32.mrf.mxu3 }
 0x152   :  { %1355 = vpow2.f32 %v1221_v55  ;;  %v640_v59 = vadd.f32 %v639_v58, %v273_v39  ;;  %v709_v55 = vpop.f32.mrf.mxu0 }
 0x153   :  { %1357 = vrcp.f32 %v718_v57  ;;  %v665_v8 = vpop.f32.mrf.mxu1  ;;  %v729_v13 = vand.u32 2147483647, %v718_v57  ;;  %v731_v14 = vand.u32 2147483648, %v718_v57  ;;  %vm725_vm1 = vweird.f32 %v718_v57 }
 0x154   :  { %v654_v62 = vadd.f32 %v653_v60, %v640_v59  ;;  %v666_v21 = vadd.f32 %v665_v8, %v274_v11 }
 0x155   :  { %vm730_vm3 = vcmp.eq.f32.partialorder %v729_v13, 8.507059e+37  ;;  %v732_v26 = vor.u32 1.1754944e-38, %v731_v14 }
 0x156   :  { %v1354_v63 = vpop.eup %1353  ;;  %v1223_v0 = vmul.f32 -1.442695, %v654_v62  ;;  %v680_v32 = vadd.f32 %v679_v16, %v666_v21 }
 0x157   :  { %v1629_v1 = vadd.f32 1.0, %v1354_v63 }
 0x158   :  { %v1356_v3 = vpop.eup %1355  ;;  %1359 = vpow2.f32 %v1223_v0 }
 0x159   :  { %v1358_v4 = vpop.eup %1357  ;;  %1361 = vrcp.f32 %v1629_v1  ;;  %v1632_v5 = vadd.f32 1.0, %v1356_v3  ;;  %v693_v7 = vpop.f32.mrf.mxu3  ;;  %vm763_vm4 = vweird.f32 %v1629_v1  ;;  %v769_v6 = vand.u32 2147483648, %v1629_v1 }
 0x15a   :  { %v721_v10 = vmul.f32 %v1358_v4, %v718_v57  ;;  %v694_v17 = vadd.f32 %v693_v7, %v275_v9  ;;  %vm726_vm0 = vweird.f32 %v1358_v4  ;;  %v767_v41 = vand.u32 2147483647, %v1629_v1 }
 0x15b   :  { %1363 = vrcp.f32 %v1632_v5  ;;  %vm727_vm2 = vmor %vm725_vm1, %vm726_vm0  ;;  %v667_v36 = vpop.f32.mrf.mxu1  ;;  %v744_v39 = vand.u32 2147483647, %v1632_v5  ;;  %v746_v40 = vand.u32 2147483648, %v1632_v5  ;;  %vm740_vm7 = vweird.f32 %v1632_v5 }
 0x15c   :  { %v722_v12 = vsub.f32 1.0, %v721_v10  ;;  %v708_v28 = vadd.f32 %v707_v22, %v694_v17  ;;  %v668_v46 = vadd.f32 %v667_v36, %v274_v11  ;;  %v770_v48 = vor.u32 1.1754944e-38, %v769_v6 }
 0x15d   :  { %vm745_vm10 = vcmp.eq.f32.partialorder %v744_v39, 8.507059e+37  ;;  %v747_v56 = vor.u32 1.1754944e-38, %v746_v40  ;;  %vm768_vm11 = vcmp.eq.f32.partialorder %v767_v41, 8.507059e+37 }
 0x15e   :  { %v1360_v15 = vpop.eup %1359  ;;  %v723_v18 = vmul.f32 %v1358_v4, %v722_v12  ;;  %v682_v61 = vadd.f32 %v681_v52, %v668_v46 }
 0x15f   :  { %v1362_v19 = vpop.eup %1361  ;;  %v1637_v20 = vadd.f32 1.0, %v1360_v15 }
 0x160   :  { %v759_v23 = vmul.f32 %v1362_v19, %v1629_v1  ;;  %v724_v24 = vadd.f32 %v1358_v4, %v723_v18  ;;  %vm764_vm5 = vweird.f32 %v1362_v19 }
 0x161   :  { %v1364_v25 = vpop.eup %1363  ;;  %1365 = vrcp.f32 %v1637_v20  ;;  %v695_v30 = vpop.f32.mrf.mxu3  ;;  %vm1650_vm8 = vmor %vm763_vm4, %vm764_vm5  ;;  %v784_v1 = vand.u32 2147483648, %v1637_v20  ;;  %v782_v2 = vand.u32 2147483647, %v1637_v20  ;;  %vm778_vm13 = vweird.f32 %v1637_v20 }
 0x162   :  { %v760_v27 = vsub.f32 1.0, %v759_v23  ;;  %v728_v29 = vsel %vm727_vm2, %v1358_v4, %v724_v24  ;;  %v736_v31 = vmul.f32 %v1364_v25, %v1632_v5  ;;  %v696_v38 = vadd.f32 %v695_v30, %v275_v9 }
 0x163   :  { %v733_v33 = vsel %vm730_vm3, %v732_v26, %v728_v29  ;;  %vm741_vm6 = vweird.f32 %v1364_v25  ;;  %v785_v11 = vor.u32 1.1754944e-38, %v784_v1  ;;  %vm783_vm15 = vcmp.eq.f32.partialorder %v782_v2, 8.507059e+37 }
 0x164   :  { %v761_v34 = vmul.f32 %v1362_v19, %v760_v27  ;;  %v788_v35 = vmul.f32 %v733_v33, %v708_v28  ;;  %v737_v37 = vsub.f32 1.0, %v736_v31  ;;  %vm742_vm9 = vmor %vm740_vm7, %vm741_vm6  ;;  %v710_v58 = vadd.f32 %v709_v55, %v696_v38 }
 0x166   :  { %v790_v42 = vadd.f32 %v788_v35, %v680_v32  ;;  %v738_v43 = vmul.f32 %v1364_v25, %v737_v37  ;;  %v762_v44 = vadd.f32 %v1362_v19, %v761_v34 }
 0x167   :  { %v1366_v45 = vpop.eup %1365 }
 0x168   :  { %v774_v49 = vmul.f32 %v1366_v45, %v1637_v20  ;;  %1367 = vtanh.f32 %v790_v42  ;;  %v739_v53 = vadd.f32 %v1364_v25, %v738_v43  ;;  %v766_v54 = vsel %vm1650_vm8, %v1362_v19, %v762_v44 }
 0x169   :  { %v771_v60 = vsel %vm768_vm11, %v770_v48, %v766_v54  ;;  %vm779_vm12 = vweird.f32 %v1366_v45 }
 0x16a   :  { %v775_v57 = vsub.f32 1.0, %v774_v49  ;;  %v743_v59 = vsel %vm742_vm9, %v1364_v25, %v739_v53  ;;  %v794_v3 = vsub.f32 1.0, %v771_v60  ;;  %vm780_vm14 = vmor %vm778_vm13, %vm779_vm12  ;;  %v798_v9 = vmul.f32 %v771_v60, %v1605_v50  ;;  %v1350_v50 = vld [vmem:[%s1684_s7] ss:$0 sm:$0xff] }
 0x16b   :  { %v748_v62 = vsel %vm745_vm10, %v747_v56, %v743_v59 }
 0x16c   :  { %v776_v63 = vmul.f32 %v1366_v45, %v775_v57  ;;  %v789_v0 = vmul.f32 %v748_v62, %v710_v58 }
 0x16e   :  { %v1368_v4 = vpop.eup %1367  ;;  %v791_v5 = vadd.f32 %v789_v0, %v682_v61  ;;  %v777_v7 = vadd.f32 %v1366_v45, %v776_v63 }
 0x16f   :  { %v796_v8 = vmul.f32 %v1368_v4, %v794_v3 }
 0x170   :  { %1369 = vtanh.f32 %v791_v5  ;;  %v781_v10 = vsel %vm780_vm14, %v1366_v45, %v777_v7 }
 0x171   :  { %v800_v12 = vadd.f32 %v798_v9, %v796_v8  ;;  %v786_v13 = vsel %vm783_vm15, %v785_v11, %v781_v10 }
 0x172   :  { %v795_v14 = vsub.f32 1.0, %v786_v13  ;;  %v799_v17 = vmul.f32 %v786_v13, %v1607_v51 }
 0x173   :  { %887 = vst [vmem:[#allocation11] sm:$0xff] %v800_v12 }
 0x176   :  { %v1370_v15 = vpop.eup %1369 }
 0x177   :  { %v797_v16 = vmul.f32 %v1370_v15, %v795_v14 }
 0x179   :  { %v801_v18 = vadd.f32 %v799_v17, %v797_v16 }
 0x17b   :  { %v802_v19 = vpack.c.bf16 %v801_v18, %v800_v12  ;;  %888 = vst [vmem:[#allocation11 + $0x8] sm:$0xff] %v801_v18 }
 0x17c   :  { %914 = dma.vmem_to_hbm [thread:$0]  %s907_s14, 256, %s909_s17, [#allocation12], %s1529_s21, %s1529_s21, %s1530_s22  }
 0x17d   :  { %879 = vmatmul.bf16.vlgmr.msra.gmra.mxu1 %v802_v19 }
 0x1fa   :  { %v880_v51 = vpop.f32.mrf.mxu1 }
 0x1fb   :  { %v881_v20 = vadd.f32 %v1350_v50, %v880_v51 }
 0x1fd   :  { %885 = vst [vmem:[#allocation10] sm:$0xff] %v881_v20 }
 0x202   :  { %v882_v21 = vpop.f32.mrf.mxu1 }
 0x203   :  { %v883_v22 = vadd.f32 %v1350_v50, %v882_v21 }
 0x205   :  { %886 = vst [vmem:[#allocation10 + $0x8] sm:$0xff] %v883_v22 }
 0x206   :  { %901 = dma.vmem_to_hbm [thread:$0]  %s894_s2, 256, %s896_s25, [#allocation4], %s1529_s21, %s1529_s21, %s1530_s22  }
 0x207   :  { %1521 = dma.done.wait [#allocation4], 256  }
 0x208   :  { %1522 = vsyncadd [#allocation4], 4294967040 }
 0x209   :  { %1523 = dma.done.wait [#allocation12], 256  }
 0x20a   :  { %1524 = vsyncadd [#allocation12], 4294967040 }
 0x20b   :  { %923 = vsyncpa [#allocation3], 1 }
 0x20c   :  { %924 = vsyncpa [#allocation6], 1 }
 0x20d   :  { %925 = vsyncpa [#allocation9], 1 }
 0x20e   :  { %926 = vsyncpa [#allocation4], 1 }
 0x20f   :  { %927 = vsyncpa [#allocation12], 1 }

</bundles_post_ra>
